<compile_context>
chip_gen: v7x
topology: tpu7x:2x2x1
jax: 0.10.0
libtpu: 0.0.40
codegen_flags: <defaults>
</compile_context>

<pallas_src>
import functools

import numpy as np
import jax
import jax.numpy as jnp
from jax.experimental import pallas as pl
from jax.experimental.pallas import tpu as pltpu


# ---------------- synthetic config (small shapes) ----------------
BATCH = 2
SEQ_LEN = 8
HIDDEN = 32
MAX_HOLDER_SPAN = 2
MAX_TARGET_SPAN = 3
MAX_SPAN = max(MAX_HOLDER_SPAN, MAX_TARGET_SPAN)
MAX_N_HOLDERS = 2
MAX_N_TARGETS = 3


# ---------------- Pallas kernel (grid over batch) ----------------
def _span_score_kernel(len_ref, emb_ref, wt_ref, bt_ref, span_ref, score_ref,
                       *, S, K, max_holder, max_target):
    """One batch element per grid step: span reps, sigmoid scores, validity mask."""
    b = pl.program_id(0)
    length = len_ref[b]                               # scalar from SMEM (prefetch)

    x = emb_ref[0]                                    # (S, H) f32
    H = x.shape[-1]

    # --- span averaging via shifted adds (replaces the dense band matmul) ---
    # slab k (k = 0..K-1) holds width-(k+1) span means; rows t >= S-k are zero,
    # exactly like torch's valid Conv1d output zero-padded at the end.
    row_s = jax.lax.broadcasted_iota(jnp.int32, (S, H), 0)
    acc = x
    slabs = [x]                                       # width 1 == the embedding
    for k in range(1, K):
        shifted = pltpu.roll(x, shift=S - k, axis=0)  # shifted[t] = x[(t+k) % S]
        acc = acc + shifted                           # acc[t] = sum x[t .. t+k]
        slabs.append(jnp.where(row_s < (S - k), acc * (1.0 / (k + 1)), 0.0))
    span_all = jnp.concatenate(slabs, axis=0)         # (K*S, H)
    span_ref[0] = span_all

    # --- holder/target scorers: one lane-dense (2,H)x(H,KS) matmul ---
    wt = wt_ref[...]                                  # (2, H): row0 holder, row1 target
    bt = bt_ref[...]                                  # (2, 1)
    logits = jax.lax.dot_general(
        wt, span_all, (((1,), (1,)), ((), ())),
        preferred_element_type=jnp.float32) + bt      # (2, K*S)
    probs = jax.nn.sigmoid(logits)

    # --- span validity (torch holder/target_span_mask loops), no int division ---
    KS = K * S
    r_idx = jax.lax.broadcasted_iota(jnp.int32, (2, KS), 1)
    row = jax.lax.broadcasted_iota(jnp.int32, (2, KS), 0)
    width = jnp.zeros((2, KS), jnp.int32)
    for k in range(1, K):                             # width = r_idx // S, by compares
        width = width + (r_idx >= k * S).astype(jnp.int32)
    start = r_idx - width * S
    max_w = jnp.where(row == 0, max_holder, max_target)
    valid = (start < (length - width)) & (width < max_w)
    score_ref[0] = jnp.where(valid, probs, -1.0)      # single dense (2, KS) store


def span_reps_and_scores(length, emb, scorer_wt, scorer_bt):
    """length (B,) int32, emb (B,S,H) f32, wt (2,H), bt (2,1) ->
       span reps (B,K*S,H), masked scores (B,2,K*S)."""
    B, S, H = emb.shape
    K = MAX_SPAN
    KS = K * S
    kernel = functools.partial(
        _span_score_kernel, S=S, K=K,
        max_holder=MAX_HOLDER_SPAN, max_target=MAX_TARGET_SPAN)
    grid_spec = pltpu.PrefetchScalarGridSpec(
        num_scalar_prefetch=1,                                  # length -> SMEM
        grid=(B,),
        in_specs=[
            pl.BlockSpec((1, S, H), lambda b, lens: (b, 0, 0)),   # emb tile per batch
            pl.BlockSpec((2, H),   lambda b, lens: (0, 0)),       # scorer wt (resident)
            pl.BlockSpec((2, 1),   lambda b, lens: (0, 0)),       # scorer bias (resident)
        ],
        out_specs=(
            pl.BlockSpec((1, KS, H), lambda b, lens: (b, 0, 0)),  # span reps
            pl.BlockSpec((1, 2, KS), lambda b, lens: (b, 0, 0)),  # masked scores
        ),
    )
    return pl.pallas_call(
        kernel,
        grid_spec=grid_spec,
        out_shape=(jax.ShapeDtypeStruct((B, KS, H), jnp.float32),
                   jax.ShapeDtypeStruct((B, 2, KS), jnp.float32)),
        compiler_params=pltpu.CompilerParams(
            dimension_semantics=("parallel",)),                   # v7x: 2 TCs share batch
    )(length, emb, scorer_wt, scorer_bt)


# ---------------- glue (plain JAX / host) ----------------
def init_params(key, H):
    ks = jax.random.split(key, 8)
    s = 0.05
    return dict(
        holder_w=jax.random.normal(ks[0], (H, 1), jnp.float32) * s,
        holder_b=jax.random.normal(ks[1], (1,), jnp.float32) * s,
        target_w=jax.random.normal(ks[2], (H, 1), jnp.float32) * s,
        target_b=jax.random.normal(ks[3], (1,), jnp.float32) * s,
        imp_w=jax.random.normal(ks[4], (H, 4), jnp.float32) * s,
        imp_b=jax.random.normal(ks[5], (1, 4), jnp.float32) * s,
        exp_w=jax.random.normal(ks[6], (2 * H, 4), jnp.float32) * s,
        exp_b=jax.random.normal(ks[7], (1, 4), jnp.float32) * s,
    )


@jax.jit
def opinion_miner_forward(embedding, mask, params):
    B, S, H = embedding.shape

    scorer_wt = jnp.concatenate(
        [params["holder_w"], params["target_w"]], axis=1).T          # (2, H)
    scorer_bt = jnp.concatenate(
        [params["holder_b"], params["target_b"]]).reshape(2, 1)      # (2, 1)
    length = jnp.sum(mask, axis=1).astype(jnp.int32)                 # (B,)

    # --- fused Pallas hot path: span reps + masked sigmoid scores ---
    span_reps, scores = span_reps_and_scores(
        length, embedding.astype(jnp.float32), scorer_wt, scorer_bt)
    holder_scores = scores[:, 0, :]     # (B, K*S), already -1 where invalid
    target_scores = scores[:, 1, :]

    # NOTE: sigmoid > 0 always, so `score > 0` == "span not masked" — same
    # behavior as the torch model.  Argsort tie-breaking may differ on exact ties.
    holder_ranks = jnp.argsort(-holder_scores, axis=1)
    target_ranks = jnp.argsort(-target_scores, axis=1)

    t_top = target_ranks[:, :MAX_N_TARGETS]                 # (B, NT)
    h_top = holder_ranks[:, :MAX_N_HOLDERS]                 # (B, NH)
    t_valid = jnp.take_along_axis(target_scores, t_top, axis=1) > 0
    h_valid = jnp.take_along_axis(holder_scores, h_top, axis=1) > 0

    t_reps = jnp.take_along_axis(
        span_reps, jnp.broadcast_to(t_top[:, :, None], (B, MAX_N_TARGETS, H)), axis=1)
    h_reps = jnp.take_along_axis(
        span_reps, jnp.broadcast_to(h_top[:, :, None], (B, MAX_N_HOLDERS, H)), axis=1)

    implicit_input = jnp.where(t_valid[..., None], t_reps, 0.0)       # (B, NT, H)
    implicit_mask = t_valid.astype(jnp.int32)

    pair_valid = h_valid[:, :, None] & t_valid[:, None, :]            # (B, NH, NT)
    h_b = jnp.broadcast_to(h_reps[:, :, None, :], (B, MAX_N_HOLDERS, MAX_N_TARGETS, H))
    t_b = jnp.broadcast_to(t_reps[:, None, :, :], (B, MAX_N_HOLDERS, MAX_N_TARGETS, H))
    pair = jnp.concatenate([h_b, t_b], axis=-1)                       # (B, NH, NT, 2H)
    explicit_input = jnp.where(pair_valid[..., None], pair, 0.0).reshape(
        B, MAX_N_HOLDERS * MAX_N_TARGETS, 2 * H)
    explicit_mask = pair_valid.reshape(B, -1).astype(jnp.int32)

    # Opinion classifiers: <2 KFLOPs each — plain XLA fuses these with the
    # gathers above; a separate pallas_call launch would cost more than the math.
    implicit_logits = (jnp.einsum("bnh,hc->bnc", implicit_input, params["imp_w"])
                       + params["imp_b"])
    explicit_logits = (jnp.einsum("bnh,hc->bnc", explicit_input, params["exp_w"])
                       + params["exp_b"])
    implicit_pred = jnp.argmax(implicit_logits, axis=2)
    explicit_pred = jnp.argmax(explicit_logits, axis=2)

    return dict(span_reps=span_reps,
                holder_scores=holder_scores, target_scores=target_scores,
                holder_ranks=holder_ranks, target_ranks=target_ranks,
                implicit_mask=implicit_mask, explicit_mask=explicit_mask,
                implicit_logits=implicit_logits, explicit_logits=explicit_logits,
                implicit_pred=implicit_pred, explicit_pred=explicit_pred)


def build_pred_tuples(out, seq_len):
    """Host-side dict construction (mirrors the torch python loops)."""
    target_ranks = np.asarray(out["target_ranks"])
    holder_ranks = np.asarray(out["holder_ranks"])
    target_scores = np.asarray(out["target_scores"])
    holder_scores = np.asarray(out["holder_scores"])
    implicit_pred = np.asarray(out["implicit_pred"])
    explicit_pred = np.asarray(out["explicit_pred"])
    B = target_ranks.shape[0]
    pred_tuples = []
    for i in range(B):
        target_to_label = {}
        holder_and_target_to_label = {}
        for j in range(MAX_N_TARGETS):
            r = int(target_ranks[i, j])
            if target_scores[i, r] > 0:
                size, start = divmod(r, seq_len)
                target_to_label[(start, start + size + 1)] = int(implicit_pred[i, j])
        for j in range(MAX_N_HOLDERS):
            p = int(holder_ranks[i, j])
            if holder_scores[i, p] > 0:
                hsize, hstart = divmod(p, seq_len)
                for k in range(MAX_N_TARGETS):
                    q = int(target_ranks[i, k])
                    if target_scores[i, q] > 0:
                        tsize, tstart = divmod(q, seq_len)
                        key = (hstart, hstart + hsize + 1, tstart, tstart + tsize + 1)
                        holder_and_target_to_label[key] = int(
                            explicit_pred[i, j * MAX_N_TARGETS + k])
        pred_tuples.append(dict(target_to_label=target_to_label,
                                holder_and_target_to_label=holder_and_target_to_label))
    return pred_tuples


if __name__ == "__main__":
    key = jax.random.PRNGKey(0)
    k_emb, k_par = jax.random.split(key)

    # synthetic encoder output (stands in for BertModel.last_hidden_state)
    embedding = jax.random.normal(k_emb, (BATCH, SEQ_LEN, HIDDEN), jnp.float32)
    lengths = np.array([SEQ_LEN, SEQ_LEN - 2], dtype=np.int32)
    mask = jnp.asarray(np.arange(SEQ_LEN)[None, :] < lengths[:, None], dtype=jnp.int32)

    params = init_params(k_par, HIDDEN)

    out = opinion_miner_forward(embedding, mask, params)
    jax.block_until_ready(out["span_reps"])
    jax.block_until_ready(out["implicit_logits"])
    jax.block_until_ready(out["explicit_logits"])

    pred_tuples = build_pred_tuples(out, SEQ_LEN)
    assert len(pred_tuples) == BATCH
    assert out["span_reps"].shape == (BATCH, MAX_SPAN * SEQ_LEN, HIDDEN)
    assert out["holder_scores"].shape == (BATCH, MAX_SPAN * SEQ_LEN)
    print("KERNEL_OK")
</pallas_src>

<mosaic_0001>
module attributes {stable_mosaic.version = 11 : i64} {
  func.func @_span_score_kernel(%arg0: i32, %arg1: memref<2xi32, #tpu.memory_space<smem>>, %arg2: memref<1x8x32xf32, #tpu.memory_space<vmem>>, %arg3: memref<2x32xf32, #tpu.memory_space<vmem>>, %arg4: memref<2x1xf32, #tpu.memory_space<vmem>>, %arg5: memref<1x24x32xf32, #tpu.memory_space<vmem>>, %arg6: memref<1x2x24xf32, #tpu.memory_space<vmem>>) attributes {dimension_semantics = [#tpu.dimension_semantics<parallel>], iteration_bounds = array<i64: 2>, scalar_prefetch = 1 : i64, scratch_operands = 0 : i64, tpu.core_type = #tpu.core_type<tc>, window_params = [{transform_indices = @transform_0, window_bounds = array<i64: 1, 8, 32>}, {pipeline_mode = #tpu.pipeline_mode<synchronous>, transform_indices = @transform_1, window_bounds = array<i64: 2, 32>}, {pipeline_mode = #tpu.pipeline_mode<synchronous>, transform_indices = @transform_2, window_bounds = array<i64: 2, 1>}, {transform_indices = @transform_3, window_bounds = array<i64: 1, 24, 32>}, {transform_indices = @transform_4, window_bounds = array<i64: 1, 2, 24>}]} {
    %0 = arith.index_cast %arg0 : i32 to index
    %1 = memref.load %arg1[%0] : memref<2xi32, #tpu.memory_space<smem>>
    %c0 = arith.constant 0 : index
    %c0_0 = arith.constant 0 : index
    %c0_1 = arith.constant 0 : index
    %2 = vector.load %arg2[%c0, %c0_0, %c0_1] : memref<1x8x32xf32, #tpu.memory_space<vmem>>, vector<1x8x32xf32>
    %3 = vector.shape_cast %2 : vector<1x8x32xf32> to vector<8x32xf32>
    %4 = tpu.iota {dimensions = array<i32: 0>} : vector<8x32xi32>
    %c7_i32 = arith.constant 7 : i32
    %5 = tpu.dynamic_rotate %3 by %c7_i32 dim 0 : vector<8x32xf32>, i32 -> vector<8x32xf32>
    %6 = arith.addf %3, %5 : vector<8x32xf32>
    %c7_i32_2 = arith.constant 7 : i32
    %7 = vector.broadcast %c7_i32_2 : i32 to vector<8x32xi32>
    %8 = arith.cmpi slt, %4, %7 : vector<8x32xi32>
    %cst = arith.constant 5.000000e-01 : f32
    %9 = vector.broadcast %cst : f32 to vector<8x32xf32>
    %10 = arith.mulf %6, %9 : vector<8x32xf32>
    %cst_3 = arith.constant 0.000000e+00 : f32
    %11 = vector.broadcast %cst_3 : f32 to vector<8x32xf32>
    %12 = arith.select %8, %10, %11 : vector<8x32xi1>, vector<8x32xf32>
    %c6_i32 = arith.constant 6 : i32
    %13 = tpu.dynamic_rotate %3 by %c6_i32 dim 0 : vector<8x32xf32>, i32 -> vector<8x32xf32>
    %14 = arith.addf %6, %13 : vector<8x32xf32>
    %c6_i32_4 = arith.constant 6 : i32
    %15 = vector.broadcast %c6_i32_4 : i32 to vector<8x32xi32>
    %16 = arith.cmpi slt, %4, %15 : vector<8x32xi32>
    %cst_5 = arith.constant 0.333333343 : f32
    %17 = vector.broadcast %cst_5 : f32 to vector<8x32xf32>
    %18 = arith.mulf %14, %17 : vector<8x32xf32>
    %cst_6 = arith.constant 0.000000e+00 : f32
    %19 = vector.broadcast %cst_6 : f32 to vector<8x32xf32>
    %20 = arith.select %16, %18, %19 : vector<8x32xi1>, vector<8x32xf32>
    %21 = tpu.concatenate %3, %12, %20 in 0 : vector<8x32xf32>, vector<8x32xf32>, vector<8x32xf32> -> vector<24x32xf32>
    %c0_7 = arith.constant 0 : index
    %c0_8 = arith.constant 0 : index
    %c0_9 = arith.constant 0 : index
    %22 = vector.load %arg5[%c0_7, %c0_8, %c0_9] : memref<1x24x32xf32, #tpu.memory_space<vmem>>, vector<1x24x32xf32>
    %23 = vector.shape_cast %22 : vector<1x24x32xf32> to vector<24x32xf32>
    %24 = vector.shape_cast %21 : vector<24x32xf32> to vector<1x24x32xf32>
    tpu.vector_store %arg5[%c0_7, %c0_8, %c0_9], %24 {strides = array<i32>} : memref<1x24x32xf32, #tpu.memory_space<vmem>>, vector<1x24x32xf32>,
    %c0_10 = arith.constant 0 : index
    %c0_11 = arith.constant 0 : index
    %25 = vector.load %arg3[%c0_10, %c0_11] : memref<2x32xf32, #tpu.memory_space<vmem>>, vector<2x32xf32>
    %c0_12 = arith.constant 0 : index
    %c0_13 = arith.constant 0 : index
    %26 = vector.load %arg4[%c0_12, %c0_13] : memref<2x1xf32, #tpu.memory_space<vmem>>, vector<2x1xf32>
    %cst_14 = arith.constant dense<0.000000e+00> : vector<2x24xf32>
    %27 = tpu.matmul %25, %21, %cst_14 {dimension_numbers = #tpu.dot_dimension_numbers<[1], [1], [0], [0], [0, 0, 1, 0], [], []>} : vector<2x32xf32>, vector<24x32xf32>, vector<2x24xf32> -> vector<2x24xf32>
    %28 = vector.broadcast %26 : vector<2x1xf32> to vector<2x24xf32>
    %29 = arith.addf %27, %28 : vector<2x24xf32>
    %30 = arith.negf %29 : vector<2x24xf32>
    %31 = math.exp %30 : vector<2x24xf32>
    %cst_15 = arith.constant 1.000000e+00 : f32
    %32 = vector.broadcast %cst_15 : f32 to vector<2x24xf32>
    %33 = arith.addf %32, %31 : vector<2x24xf32>
    %34 = arith.divf %32, %33 : vector<2x24xf32>
    %35 = tpu.iota {dimensions = array<i32: 1>} : vector<2x24xi32>
    %36 = tpu.iota {dimensions = array<i32: 0>} : vector<2x24xi32>
    %c0_i32 = arith.constant 0 : i32
    %37 = vector.broadcast %c0_i32 : i32 to vector<2x24xi32>
    %c8_i32 = arith.constant 8 : i32
    %38 = vector.broadcast %c8_i32 : i32 to vector<2x24xi32>
    %39 = arith.cmpi sge, %35, %38 : vector<2x24xi32>
    %40 = arith.extui %39 : vector<2x24xi1> to vector<2x24xi32>
    %41 = arith.addi %37, %40 : vector<2x24xi32>
    %c16_i32 = arith.constant 16 : i32
    %42 = vector.broadcast %c16_i32 : i32 to vector<2x24xi32>
    %43 = arith.cmpi sge, %35, %42 : vector<2x24xi32>
    %44 = arith.extui %43 : vector<2x24xi1> to vector<2x24xi32>
    %45 = arith.addi %41, %44 : vector<2x24xi32>
    %c8_i32_16 = arith.constant 8 : i32
    %46 = vector.broadcast %c8_i32_16 : i32 to vector<2x24xi32>
    %47 = arith.muli %45, %46 : vector<2x24xi32>
    %48 = arith.subi %35, %47 : vector<2x24xi32>
    %c0_i32_17 = arith.constant 0 : i32
    %49 = vector.broadcast %c0_i32_17 : i32 to vector<2x24xi32>
    %50 = arith.cmpi eq, %36, %49 : vector<2x24xi32>
    %c2_i32 = arith.constant 2 : i32
    %c3_i32 = arith.constant 3 : i32
    %51 = vector.broadcast %c2_i32 : i32 to vector<2x24xi32>
    %52 = vector.broadcast %c3_i32 : i32 to vector<2x24xi32>
    %53 = arith.select %50, %51, %52 : vector<2x24xi1>, vector<2x24xi32>
    %54 = vector.broadcast %1 : i32 to vector<2x24xi32>
    %55 = arith.subi %54, %45 : vector<2x24xi32>
    %56 = arith.cmpi slt, %48, %55 : vector<2x24xi32>
    %57 = arith.cmpi slt, %45, %53 : vector<2x24xi32>
    %58 = arith.andi %56, %57 : vector<2x24xi1>
    %cst_18 = arith.constant -1.000000e+00 : f32
    %59 = vector.broadcast %cst_18 : f32 to vector<2x24xf32>
    %60 = arith.select %58, %34, %59 : vector<2x24xi1>, vector<2x24xf32>
    %c0_19 = arith.constant 0 : index
    %c0_20 = arith.constant 0 : index
    %c0_21 = arith.constant 0 : index
    %61 = vector.load %arg6[%c0_19, %c0_20, %c0_21] : memref<1x2x24xf32, #tpu.memory_space<vmem>>, vector<1x2x24xf32>
    %62 = vector.shape_cast %61 : vector<1x2x24xf32> to vector<2x24xf32>
    %63 = vector.shape_cast %60 : vector<2x24xf32> to vector<1x2x24xf32>
    tpu.vector_store %arg6[%c0_19, %c0_20, %c0_21], %63 {strides = array<i32>} : memref<1x2x24xf32, #tpu.memory_space<vmem>>, vector<1x2x24xf32>,
    return
  }
  func.func @transform_0(%arg0: i32, %arg1: memref<2xi32, #tpu.memory_space<smem>>) -> (i32, i32, i32) {
    %c0_i32 = arith.constant 0 : i32
    %c0_i32_0 = arith.constant 0 : i32
    %c0_i32_1 = arith.constant 0 : i32
    return %arg0, %c0_i32, %c0_i32_0 : i32, i32, i32
  }
  func.func @transform_1(%arg0: i32, %arg1: memref<2xi32, #tpu.memory_space<smem>>) -> (i32, i32) {
    %c0_i32 = arith.constant 0 : i32
    %c0_i32_0 = arith.constant 0 : i32
    %c0_i32_1 = arith.constant 0 : i32
    return %c0_i32, %c0_i32_0 : i32, i32
  }
  func.func @transform_2(%arg0: i32, %arg1: memref<2xi32, #tpu.memory_space<smem>>) -> (i32, i32) {
    %c0_i32 = arith.constant 0 : i32
    %c0_i32_0 = arith.constant 0 : i32
    %c0_i32_1 = arith.constant 0 : i32
    return %c0_i32, %c0_i32_0 : i32, i32
  }
  func.func @transform_3(%arg0: i32, %arg1: memref<2xi32, #tpu.memory_space<smem>>) -> (i32, i32, i32) {
    %c0_i32 = arith.constant 0 : i32
    %c0_i32_0 = arith.constant 0 : i32
    %c0_i32_1 = arith.constant 0 : i32
    return %arg0, %c0_i32, %c0_i32_0 : i32, i32, i32
  }
  func.func @transform_4(%arg0: i32, %arg1: memref<2xi32, #tpu.memory_space<smem>>) -> (i32, i32, i32) {
    %c0_i32 = arith.constant 0 : i32
    %c0_i32_0 = arith.constant 0 : i32
    %c0_i32_1 = arith.constant 0 : i32
    return %arg0, %c0_i32, %c0_i32_0 : i32, i32, i32
  }
}

</mosaic_0001>

<bundles_post_ra>
// kernel: neg.3
= control target key start
LH: loop header
LB: loop body
LE: loop exit
PB: predicated region body
PF: predicated region fallthrough
CT: control target
= control target key end

     0   :  { %s24_s0 = inlined_call_operand.vmem [shape: f32[2,24], index: 0, kind: input, shape index: {}]   ;;  %s25_s1 = inlined_call_operand.vmem [shape: f32[2,24], index: 1, kind: output, shape index: {}]  }
   0x1   :  { %v2_v0 = vld [vmem:[%s24_s0] sm:$0x3] }
   0x2   :  { %v5_v1 = vxor.u32 2147483648, %v2_v0 }
   0x4   :  { %7 = vst [vmem:[%s25_s1] sm:$0x3] %v5_v1 }

// kernel: opinion_miner_forward.1
= control target key start
LH: loop header
LB: loop body
LE: loop exit
PB: predicated region body
PF: predicated region fallthrough
CT: control target
= control target key end

     0   :  { %s588_s0 = inlined_call_operand.vmem [shape: s32[2], index: 0, kind: input, shape index: {}]   ;;  %s589_s1 = inlined_call_operand.vmem [shape: f32[2,8,32], index: 1, kind: input, shape index: {}]   ;;  %s590_s2 = inlined_call_operand.vmem [shape: f32[2,32], index: 2, kind: input, shape index: {}]   ;;  %s591_s3 = inlined_call_operand.vmem [shape: f32[2,1], index: 3, kind: input, shape index: {}]   ;;  %s592_s4 = inlined_call_operand.vmem [shape: f32[2,24,32], index: 4, kind: output, shape index: {0}]   ;;  %s593_s5 = inlined_call_operand.vmem [shape: f32[2,2,24], index: 5, kind: output, shape index: {1}]  }
   0x1   :  { %s11_s20 = sshll.u32 %s588_s0, 4  ;;  %s12_s20 = int_to_ptr.vmem [resolvable:$true] %s11_s20 }
   0x2   :  { %s483_s21 = scalar_lea.vmem %s12_s20, 16  ;;  %p488_p1 = scmp.lt.s32.totalorder %s12_s20, %s12_s20 }
   0x3   :  { %p484_p0 = scmp.ne.s32.totalorder %s12_s20, %s483_s21  ;;  %p489_p2 = scmp.lt.s32.totalorder %s483_s21, %s483_s21 }
   0x5   :  { %p490_p3 = por %p489_p2, %p488_p1 }
   0x7   :  { %p491_p4 = pnand %p490_p3, %p484_p0 }
   0x9   :  { %494 = shalt.err (!%p491_p4)  }
   0xa   :  { %s505_s22 = smov [#allocation3]  }
   0xb   :  { %14 = dma.vmem_to_smem %s12_s20, 16, %s505_s22, [#allocation2] }
   0xc   :  { %499 = dma.done.wait [#allocation2], 16 }
   0xd   :  { %500 = vsyncadd [#allocation2], 4294967280 }
   0xe   :  { %16 = sfence }
   0xf   :  { %s544_s23 = smov 0  }
  0x10 LB: > { %s431_s0 = sadd.s32 4294967295, %s503_s23   ;;  %p435_p5 = scmp.ge.s32.totalorder %s503_s23, 1  ;;  %s503_s23 = sphi %s544_s23, %s22_s23  }
  0x11   : > { %p171_p6 = scmp.lt.s32.totalorder %s503_s23, 3 }
  0x13   : > { %p172_p7 = pnand %p435_p5, %p171_p6 }
  0x14   : > { %p200_p8 = scmp.lt.s32.totalorder (!%p172_p7), %s431_s0, 1  ;;  %v215_v0 = vlaneseq (!%p172_p7)  ;;  %v506_v1 = vmov (!%p172_p7), 0.0|0.0   ;;  %s213_s24 = sld [smem:[#allocation3 + %s431_s0]] (!%p172_p7)  ;;  %v232_v2 = vld [vmem:[%s591_s3] sm:$0x3] (!%p172_p7)  ;;  %vm507_vm0 = vmmov (!%p172_p7), 0  }
  0x15   : > { %175 = sbr.rel (%p172_p7) target bundleno = 294 (0x126), region = 32  ;;  %459 = vmatprep.subr.bf16.mxu0 (!%p172_p7), %v506_v1  ;;  %v508_v3 = vmov (!%p172_p7), 0.0   ;;  %v509_v4 = vmov (!%p172_p7), 0   ;;  %vm227_vm4 = vcmask (!%p172_p7), 261120   ;;  %v510_v11 = vmov (!%p172_p7), 3  }
  0x16   : > { %456 = vmatprep.mubr.msk.f32.mxu0 (!%p172_p7), %vm507_vm0, %v508_v3  ;;  %478 = vset.pattern.permute.xlu0 (!%p172_p7), %v509_v4  ;;  %v327_v5 = vand.u32 (!%p172_p7), 127, %v215_v0  ;;  %v216_v6 = vshrl.u32 (!%p172_p7), %v215_v0, 7  ;;  %vm461_vm7 = vmpackc.low (!%p172_p7), %vm227_vm4, %vm227_vm4  ;;  %v231_v27 = vld [vmem:[%s590_s2] sm:$0x3] (!%p172_p7)  ;;  %vm343_vm11 = vcmask (!%p172_p7), 189440  }
  0x17   : > { %235 = vperm.xlu0 (!%p172_p7), %478, %v232_v2  }
  0x18   : > { %vm328_vm1 = vcmp.ge.s32.totalorder (!%p172_p7), %v327_v5, 8  ;;  %vm330_vm2 = vcmp.ge.s32.totalorder (!%p172_p7), %v327_v5, 16  ;;  %vm335_vm3 = vcmp.eq.s32.totalorder (!%p172_p7), %v216_v6, 0  ;;  %vm219_vm6 = vcmp.lt.s32.totalorder (!%p172_p7), %v216_v6, 7 }
  0x19   : > { %v329_v7 = vsel (!%p172_p7), %vm328_vm1, 1, %v509_v4  ;;  %v331_v8 = vsel (!%p172_p7), %vm330_vm2, 1, %v509_v4  ;;  %v336_v12 = vsel (!%p172_p7), %vm335_vm3, 2, %v510_v11  ;;  %vm224_vm8 = vcmp.lt.s32.totalorder (!%p172_p7), %v216_v6, 6 }
  0x1a   : > { %v332_v10 = vadd.s32 (!%p172_p7), %v331_v8, %v329_v7  ;;  %v337_v15 = vstv (!%p172_p7), %s213_s24 }
  0x1c   : > { %s597_s0 = smov (!%p200_p8, %s431_s0), 1  ;;  %v333_v16 = vmul.u32 8, %v332_v10  ;;  %v338_v17 = vsub.s32 %v337_v15, %v332_v10  ;;  %vm340_vm5 = vcmp.lt.s32.totalorder %v332_v10, %v336_v12 }
  0x1d   : > { %s436_s27 = sshll.u32 %s597_s0, 3  ;;  %s463_s28 = smul.u32 24, %s597_s0 }
  0x1e   : > { %s203_s6 = scalar_lea.vmem %s589_s1, %s436_s27  ;;  %v334_v19 = vsub.s32 %v327_v5, %v333_v16  ;;  %s438_s12 = sshll.u32 %s597_s0, 1 }
  0x1f   : > { %s208_s9 = scalar_lea.vmem %s592_s4, %s463_s28  ;;  %v214_v9 = vld [vmem:[%s203_s6] sm:$0xff]  ;;  %s212_s15 = scalar_lea.vmem %s593_s5, %s438_s12 }
  0x20   : > { %v217_v13 = vrot.slane %v214_v9, 1  ;;  %228 = vst.msk [vmem:[%s208_s9] sm:$0xff] %vm227_vm4, %v214_v9  ;;  %v222_v14 = vrot.slane %v214_v9, 2  ;;  %vm339_vm9 = vcmp.lt.s32.totalorder %v334_v19, %v338_v17 }
  0x21   : > { %vm568_vm10 = vmand %vm339_vm9, %vm340_vm5 }
  0x22   : > { %v218_v18 = vadd.f32 %v217_v13, %v214_v9 }
  0x24   : > { %v220_v20 = vmul.f32 0.5, %v218_v18  ;;  %v223_v21 = vadd.f32 %v222_v14, %v218_v18 }
  0x26   : > { %v221_v22 = vsel %vm219_vm6, %v220_v20, 0.0  ;;  %v225_v23 = vmul.f32 0.33333334, %v223_v21 }
  0x27   : > { %229 = vst.msk [vmem:[%s208_s9 + $0x8] sm:$0xff] %vm227_vm4, %v221_v22  ;;  %v460_v25 = vpack.c.bf16 %v221_v22, %v214_v9 }
  0x28   : > { %v226_v26 = vsel %vm224_vm8, %v225_v23, 0.0 }
  0x29   : > { %462 = vmatpush3.bf16.xpose.msk.msra.mxu0 %vm461_vm7, %v460_v25  ;;  %230 = vst.msk [vmem:[%s208_s9 + $0x10] sm:$0xff] %vm227_vm4, %v226_v26 }
  0x2a   : > { %454 = vmatprep.subr.mxu0 %v508_v3 }
  0x31   : > { %455 = vmatpush3.xpose.msk.msra.mxu0 %vm227_vm4, %v226_v26 }
  0x34   : > { %457 = vmatmul.mubr.msk.f32.vlgmr.msra.gmra.mrb[0].mxu0 %vm227_vm4, %v231_v27 }
  0x96   : > { %v236_v28 = vpop.permute.xlu0 %235 }
 0x107   : > { %v316_v29 = vpop.f32.mrb[0].mxu0 }
 0x108   : > { %v317_v30 = vadd.f32 %v316_v29, %v236_v28  ;;  %v458_v31 = vpop.f32.mrb[1].mxu0 }
 0x10a   : > { %v443_v32 = vmul.f32 -1.442695, %v317_v30 }
 0x10c   : > { %479 = vpow2.f32 %v443_v32 }
 0x116   : > { %v480_v33 = vpop.eup %479 }
 0x117   : > { %v323_v34 = vadd.f32 1.0, %v480_v33 }
 0x119   : > { %481 = vrcp.f32 %v323_v34 }
 0x123   : > { %v482_v35 = vpop.eup %481 }
 0x124   : > { %v342_v36 = vsel %vm568_vm10, %v482_v35, -1.0 }
 0x125   : > { %344 = vst.msk [vmem:[%s212_s15] sm:$0x3] %vm343_vm11, %v342_v36 }
 0x126 PF: > { %s22_s23 = sadd.s32 1, %s503_s23  }
 0x127   : > { %p19_p9 = scmp.ge.s32.totalorder %s22_s23, 4  }
 0x129   :  { %21 = sbr.rel (!%p19_p9) target bundleno = 16 (0x10), region = 74 }

</bundles_post_ra>
